<compile_context>
chip_gen: v5e
topology: v5e:2x2
jax: 0.10.0
libtpu: 0.0.40
codegen_flags: <defaults>
</compile_context>

<pallas_src>
import functools

import jax
import jax.numpy as jnp
from jax.experimental import pallas as pl
from jax.experimental.pallas import tpu as pltpu


def _round_up(x, m):
    return (x + m - 1) // m * m


@functools.lru_cache(maxsize=1)
def _vmem_capacity_bytes():
    try:
        return int(pltpu.get_tpu_info().vmem_capacity_bytes)
    except Exception:
        return 64 * 1024 * 1024  # v7x per-core size: safe lower bound everywhere


def _plan(itemsize):
    """Per-chip block-size / VMEM-limit plan (dtype-aware)."""
    cap = _vmem_capacity_bytes()
    if cap <= 80 * 1024 * 1024:
        # v7x-class (64 MiB VMEM, ~3.2 TB/s HBM): bigger blocks to amortize the
        # ~0.35 us per-grid-step overhead.
        pass2_block = 8 * 1024 * 1024
        vmem_limit = max(min(cap - 12 * 1024 * 1024, 48 * 1024 * 1024),
                         24 * 1024 * 1024)
    else:
        # v5e/v6e-class (128 MiB VMEM): 4 MiB blocks already sit near the
        # HBM roofline sweet spot.
        pass2_block = 4 * 1024 * 1024
        vmem_limit = 48 * 1024 * 1024
    pass1_block = 2 * pass2_block          # pass 1 only streams input (outputs tiny)
    resident_budget = max(int(cap * 0.60), 16 * 1024 * 1024)
    resident_limit = int(cap * 0.85)
    granule = max(8, 32 // itemsize)       # f32: 8, bf16: 16, int8/fp8: 32 sublanes
    return pass1_block, pass2_block, vmem_limit, resident_budget, resident_limit, granule


def _choose_tiles(R, C, itemsize, target_bytes, granule, row_splits=1):
    """Pick (row_tile, col_tile) for streaming an (R, C) matrix of `itemsize` bytes."""
    # Lane (last-dim) tile: full C when a (granule, C) slab fits the target,
    # otherwise a 128-multiple chunk (keeps loads/stores lane-dense).
    if C <= 128 or C * granule * itemsize <= target_bytes:
        tc = C
    else:
        tc = max(128, (target_bytes // (granule * itemsize)) // 128 * 128)
        tc = min(tc, C)
    # Sublane (row) tile: multiple of the packing granule, as many rows of
    # width tc as fit the per-block budget; full extent when R is tiny.
    if R <= granule:
        tr = R
    else:
        rows = max(granule, target_bytes // (tc * itemsize))
        tr = max(granule, min((rows // granule) * granule, (R // granule) * granule))
        # Megacore (v7x has 2 TCs): keep >= `row_splits` steps on the parallel
        # row axis so no core idles for a whole HBM sweep.
        if row_splits > 1 and R >= row_splits * granule:
            tr = min(tr, max(granule, (R // row_splits) // granule * granule))
    return tr, tc


# ---------------------------------------------------------------------------
# Kernels
# ---------------------------------------------------------------------------
def _resident_kernel(x_ref, g_ref, b_ref, o_ref, *, inv_count, eps):
    """Single-pass BN with the whole tensor resident in VMEM (1 read + 1 write)."""
    x = x_ref[...].astype(jnp.float32)                           # (B, H, C)
    s = jnp.sum(jnp.sum(x, axis=2, keepdims=True), axis=0, keepdims=True)
    mean = s * inv_count                                         # (1, H, 1)
    centered = x - mean
    q = jnp.sum(jnp.sum(centered * centered, axis=2, keepdims=True),
                axis=0, keepdims=True)
    var = q * inv_count                                          # biased (PyTorch BN)
    scale = g_ref[...] * jax.lax.rsqrt(var + eps)                # (1, H, 1)
    o_ref[...] = (centered * scale + b_ref[...]).astype(o_ref.dtype)


def _row_stats_kernel(x_ref, s_ref, q_ref, *, tc, C):
    """Per-row sum / sum-of-squares, accumulated over the column (lane) axis."""
    j = pl.program_id(1)

    @pl.when(j == 0)
    def _():
        s_ref[...] = jnp.zeros_like(s_ref)
        q_ref[...] = jnp.zeros_like(q_ref)

    x = x_ref[...].astype(jnp.float32)                           # (tr, tc)

    def _accumulate(v):
        s_ref[...] += jnp.sum(v, axis=1, keepdims=True)
        q_ref[...] += jnp.sum(v * v, axis=1, keepdims=True)

    if C % tc != 0:
        last = pl.num_programs(1) - 1

        @pl.when(j < last)                       # hot path: no mask work
        def _():
            _accumulate(x)

        @pl.when(j == last)                      # mask only the ragged final tile
        def _():
            col = jax.lax.broadcasted_iota(jnp.int32, x.shape, 1)
            _accumulate(jnp.where(j * tc + col < C, x, 0.0))
    else:
        _accumulate(x)


def _norm_kernel(x_ref, sc_ref, sh_ref, o_ref):
    """y = x * scale[row] + shift[row]  (single FMA, lane-dense stores)."""
    x = x_ref[...].astype(jnp.float32)                           # (tr, tc)
    o_ref[...] = (x * sc_ref[...] + sh_ref[...]).astype(o_ref.dtype)


# ---------------------------------------------------------------------------
# Wrapper
# ---------------------------------------------------------------------------
@functools.partial(jax.jit, static_argnames=("eps", "force_tiled"))
def batch_norm_edge(e, gamma, beta, eps=1e-5, force_tiled=False):
    """Forward pass of BatchNormEdge.

    Args:
      e:     (B, H, N, N) edge features (NCHW, matching the PyTorch module).
      gamma: (H,) affine scale.
      beta:  (H,) affine shift.
    Returns:
      (B, H, N, N) normalized edge features, same dtype as `e`.
    """
    B, H, N1, N2 = e.shape
    C = N1 * N2
    R = B * H
    itemsize = jnp.dtype(e.dtype).itemsize
    (pass1_block, pass2_block, vmem_limit,
     resident_budget, resident_limit, granule) = _plan(itemsize)

    count = float(B) * float(C)                    # B * N * N elements per channel
    gamma_f = gamma.astype(jnp.float32)
    beta_f = beta.astype(jnp.float32)

    # ---------------- VMEM-resident single-pass path -----------------------
    lanes = _round_up(C, 128)
    pad_io = B * _round_up(H, granule) * lanes * itemsize        # one padded buffer
    pad_f32 = B * _round_up(H, 8) * lanes * 4
    resident_need = 2 * pad_io + 4 * pad_f32                     # in + out + f32 temps
    if (not force_tiled) and resident_need <= resident_budget:
        x3 = e.reshape(B, H, C)                    # pure reshape: no relayout
        out = pl.pallas_call(
            functools.partial(_resident_kernel, inv_count=1.0 / count, eps=eps),
            out_shape=jax.ShapeDtypeStruct((B, H, C), e.dtype),
            in_specs=[pl.BlockSpec(memory_space=pltpu.MemorySpace.VMEM)] * 3,
            out_specs=pl.BlockSpec(memory_space=pltpu.MemorySpace.VMEM),
            compiler_params=pltpu.CompilerParams(vmem_limit_bytes=resident_limit),
        )(x3, gamma_f.reshape(1, H, 1), beta_f.reshape(1, H, 1))
        return out.reshape(B, H, N1, N2)

    # ---------------- Tiled two-pass streaming path -------------------------
    x = e.reshape(R, C)                            # pure reshape: no relayout

    # Pass 1: per-row (sum, sumsq); reduction (column) axis last.
    tr1, tc1 = _choose_tiles(R, C, itemsize, pass1_block, granule, row_splits=2)
    nr1, nc1 = pl.cdiv(R, tr1), pl.cdiv(C, tc1)
    row_sum, row_sq = pl.pallas_call(
        functools.partial(_row_stats_kernel, tc=tc1, C=C),
        out_shape=(jax.ShapeDtypeStruct((R, 1), jnp.float32),
                   jax.ShapeDtypeStruct((R, 1), jnp.float32)),
        grid_spec=pltpu.PrefetchScalarGridSpec(
            num_scalar_prefetch=0,
            grid=(nr1, nc1),
            in_specs=[pl.BlockSpec((tr1, tc1), lambda i, j: (i, j))],
            out_specs=[pl.BlockSpec((tr1, 1), lambda i, j: (i, 0)),
                       pl.BlockSpec((tr1, 1), lambda i, j: (i, 0))],
        ),
        compiler_params=pltpu.CompilerParams(
            dimension_semantics=("parallel", "arbitrary"),
            vmem_limit_bytes=vmem_limit),
    )(x)

    # Tiny per-channel combine + finalize (H-sized arrays, negligible).
    # Note: E[x^2]-mean^2 in f32 can cancel for |mean| >> std; a shifted variance
    # would cost one extra full HBM read on this (non-resident) path.
    ch_sum = row_sum.reshape(B, H).sum(axis=0)
    ch_sq = row_sq.reshape(B, H).sum(axis=0)
    mean = ch_sum / count
    var = ch_sq / count - mean * mean              # biased variance (PyTorch BN)
    scale = gamma_f * jax.lax.rsqrt(var + eps)
    shift = beta_f - mean * scale
    row_scale = jnp.tile(scale, B).reshape(R, 1)   # row r -> channel r % H
    row_shift = jnp.tile(shift, B).reshape(R, 1)

    # Pass 2: elementwise normalize + affine as one FMA.
    tr2, tc2 = _choose_tiles(R, C, itemsize, pass2_block, granule, row_splits=2)
    nr2, nc2 = pl.cdiv(R, tr2), pl.cdiv(C, tc2)
    out = pl.pallas_call(
        _norm_kernel,
        out_shape=jax.ShapeDtypeStruct((R, C), e.dtype),
        grid_spec=pltpu.PrefetchScalarGridSpec(
            num_scalar_prefetch=0,
            grid=(nr2, nc2),
            in_specs=[pl.BlockSpec((tr2, tc2), lambda i, j: (i, j)),
                      pl.BlockSpec((tr2, 1), lambda i, j: (i, 0)),
                      pl.BlockSpec((tr2, 1), lambda i, j: (i, 0))],
            out_specs=pl.BlockSpec((tr2, tc2), lambda i, j: (i, j)),
        ),
        compiler_params=pltpu.CompilerParams(
            dimension_semantics=("parallel", "parallel"),
            vmem_limit_bytes=vmem_limit),
    )(x, row_scale, row_shift)

    return out.reshape(B, H, N1, N2)               # pure reshape back to NCHW


def _reference(e, gamma, beta, eps=1e-5):
    """Pure-JAX reference matching nn.BatchNorm2d(track_running_stats=False)."""
    mean = jnp.mean(e, axis=(0, 2, 3), keepdims=True)
    var = jnp.var(e, axis=(0, 2, 3), keepdims=True)   # biased
    g = gamma.reshape(1, -1, 1, 1)
    b = beta.reshape(1, -1, 1, 1)
    return (e - mean) * jax.lax.rsqrt(var + eps) * g + b


if __name__ == "__main__":
    key = jax.random.PRNGKey(0)
    k_e, k_g, k_b = jax.random.split(key, 3)

    B, H, N = 2, 4, 16  # (batch, hidden_dim, num_nodes)
    e = jax.random.normal(k_e, (B, H, N, N), dtype=jnp.float32)

    # Randomized affine params (instead of default ones/zeros) to exercise the
    # affine path; deterministic via PRNGKey(0).
    gamma = 1.0 + 0.1 * jax.random.normal(k_g, (H,), dtype=jnp.float32)
    beta = 0.1 * jax.random.normal(k_b, (H,), dtype=jnp.float32)

    ref = _reference(e, gamma, beta)

    # Resident single-pass path (what small tensors take).
    out = jax.block_until_ready(batch_norm_edge(e, gamma, beta))
    assert out.shape == e.shape and out.dtype == e.dtype
    assert jnp.allclose(out, ref, atol=1e-4, rtol=1e-4)

    # Tiled two-pass fallback path (what large tensors take).
    out_tiled = jax.block_until_ready(
        batch_norm_edge(e, gamma, beta, force_tiled=True))
    assert jnp.allclose(out_tiled, ref, atol=1e-4, rtol=1e-4)

    print("KERNEL_OK")
</pallas_src>

<mosaic_0001>
module attributes {stable_mosaic.version = 11 : i64} {
  func.func @_resident_kernel(%arg0: memref<2x4x256xf32, #tpu.memory_space<vmem>>, %arg1: memref<1x4x1xf32, #tpu.memory_space<vmem>>, %arg2: memref<1x4x1xf32, #tpu.memory_space<vmem>>, %arg3: memref<2x4x256xf32, #tpu.memory_space<vmem>>) attributes {dimension_semantics = [], scalar_prefetch = 0 : i64, scratch_operands = 0 : i64, tpu.core_type = #tpu.core_type<tc>} {
    %c0 = arith.constant 0 : index
    %c0_0 = arith.constant 0 : index
    %c0_1 = arith.constant 0 : index
    %0 = vector.load %arg0[%c0, %c0_0, %c0_1] : memref<2x4x256xf32, #tpu.memory_space<vmem>>, vector<2x4x256xf32>
    %cst = arith.constant dense<0.000000e+00> : vector<2x4xf32>
    %1 = vector.multi_reduction <add>, %0, %cst [2] : vector<2x4x256xf32> to vector<2x4xf32>
    %2 = vector.shape_cast %1 : vector<2x4xf32> to vector<2x4x1xf32>
    %cst_2 = arith.constant dense<0.000000e+00> : vector<4x1xf32>
    %3 = vector.multi_reduction <add>, %2, %cst_2 [0] : vector<2x4x1xf32> to vector<4x1xf32>
    %4 = vector.shape_cast %3 : vector<4x1xf32> to vector<1x4x1xf32>
    %cst_3 = arith.constant 0.001953125 : f32
    %5 = vector.broadcast %cst_3 : f32 to vector<1x4x1xf32>
    %6 = arith.mulf %4, %5 : vector<1x4x1xf32>
    %7 = vector.broadcast %6 : vector<1x4x1xf32> to vector<2x4x256xf32>
    %8 = arith.subf %0, %7 : vector<2x4x256xf32>
    %9 = arith.mulf %8, %8 : vector<2x4x256xf32>
    %cst_4 = arith.constant dense<0.000000e+00> : vector<2x4xf32>
    %10 = vector.multi_reduction <add>, %9, %cst_4 [2] : vector<2x4x256xf32> to vector<2x4xf32>
    %11 = vector.shape_cast %10 : vector<2x4xf32> to vector<2x4x1xf32>
    %cst_5 = arith.constant dense<0.000000e+00> : vector<4x1xf32>
    %12 = vector.multi_reduction <add>, %11, %cst_5 [0] : vector<2x4x1xf32> to vector<4x1xf32>
    %13 = vector.shape_cast %12 : vector<4x1xf32> to vector<1x4x1xf32>
    %cst_6 = arith.constant 0.001953125 : f32
    %14 = vector.broadcast %cst_6 : f32 to vector<1x4x1xf32>
    %15 = arith.mulf %13, %14 : vector<1x4x1xf32>
    %c0_7 = arith.constant 0 : index
    %c0_8 = arith.constant 0 : index
    %c0_9 = arith.constant 0 : index
    %16 = vector.load %arg1[%c0_7, %c0_8, %c0_9] : memref<1x4x1xf32, #tpu.memory_space<vmem>>, vector<1x4x1xf32>
    %cst_10 = arith.constant 9.99999974E-6 : f32
    %17 = vector.broadcast %cst_10 : f32 to vector<1x4x1xf32>
    %18 = arith.addf %15, %17 : vector<1x4x1xf32>
    %19 = math.rsqrt %18 : vector<1x4x1xf32>
    %20 = arith.mulf %16, %19 : vector<1x4x1xf32>
    %21 = vector.broadcast %20 : vector<1x4x1xf32> to vector<2x4x256xf32>
    %22 = arith.mulf %8, %21 : vector<2x4x256xf32>
    %c0_11 = arith.constant 0 : index
    %c0_12 = arith.constant 0 : index
    %c0_13 = arith.constant 0 : index
    %23 = vector.load %arg2[%c0_11, %c0_12, %c0_13] : memref<1x4x1xf32, #tpu.memory_space<vmem>>, vector<1x4x1xf32>
    %24 = vector.broadcast %23 : vector<1x4x1xf32> to vector<2x4x256xf32>
    %25 = arith.addf %22, %24 : vector<2x4x256xf32>
    %c0_14 = arith.constant 0 : index
    %c0_15 = arith.constant 0 : index
    %c0_16 = arith.constant 0 : index
    %26 = vector.load %arg3[%c0_14, %c0_15, %c0_16] : memref<2x4x256xf32, #tpu.memory_space<vmem>>, vector<2x4x256xf32>
    tpu.vector_store %arg3[%c0_14, %c0_15, %c0_16], %25 {strides = array<i32>} : memref<2x4x256xf32, #tpu.memory_space<vmem>>, vector<2x4x256xf32>,
    return
  }
}

</mosaic_0001>

<bundles_post_ra>
// kernel: batch_norm_edge.1
= control target key start
LH: loop header
LB: loop body
LE: loop exit
PB: predicated region body
PF: predicated region fallthrough
CT: control target
= control target key end

     0   :  { %vm29_vm0 = vcmask 1043456   ;;  %v129_v13 = vmov 839922192   ;;  %v130_v36 = vmov 0   ;;  %s181_s0 = inlined_call_operand.vmem [shape: f32[2,4,256], index: 0, kind: input, shape index: {}]   ;;  %s182_s1 = inlined_call_operand.vmem [shape: f32[1,4,1], index: 1, kind: input, shape index: {}]   ;;  %s183_s2 = inlined_call_operand.vmem [shape: f32[1,4,1], index: 2, kind: input, shape index: {}]   ;;  %s184_s3 = inlined_call_operand.vmem [shape: f32[2,4,256], index: 3, kind: output, shape index: {}]  }
   0x1   :  { %v14_v0 = vld [vmem:[%s181_s0] sm:$0xff]  ;;  %v15_v1 = vld [vmem:[%s181_s0 + $0x8] sm:$0xff]  ;;  %v46_v14 = vunpack.c.l.s4 %v129_v13  ;;  %125 = vset.pattern.permute.xlu2 %v130_v36  ;;  %126 = vset.pattern.permute.xlu0 %v130_v36 }
   0x2   :  { %18 = vst [vmem:[#allocation1] ss:$2 sm:$0xff] %v14_v0  ;;  %v81_v49 = vld [vmem:[%s182_s1] sm:$0xf] }
   0x3   :  { %22 = vst [vmem:[#allocation1 + $0x10] ss:$2 sm:$0xff] %v15_v1  ;;  %v47_v18 = vunpack.c.0.s8 %v46_v14  ;;  %v105_v53 = vld [vmem:[%s183_s2] sm:$0xf] }
   0x9   :  { %v19_v2 = vld.sshfl [vmem:[#allocation1] sm:$0xff pattern:$0x75316420]  ;;  %v20_v3 = vld.sshfl [vmem:[#allocation1 + $0x8] sm:$0xff pattern:$0x75316420] }
   0xa   :  { %v30_v4 = vsel %vm29_vm0, %v19_v2, 0.0  ;;  %v31_v5 = vsel %vm29_vm0, %v20_v3, 0.0  ;;  %v23_v7 = vld.sshfl [vmem:[#allocation1 + $0x10] sm:$0xff pattern:$0x75316420] }
   0xb   :  { %v32_v6 = vadd.f32 %v31_v5, %v30_v4  ;;  %v24_v8 = vld.sshfl [vmem:[#allocation1 + $0x18] sm:$0xff pattern:$0x75316420]  ;;  %v35_v9 = vsel %vm29_vm0, %v23_v7, 0.0 }
   0xc   :  { %v36_v10 = vsel %vm29_vm0, %v24_v8, 0.0 }
   0xd   :  { %33 = vadd.xlane.f32.xlu0 %v32_v6  ;;  %v37_v11 = vadd.f32 %v36_v10, %v35_v9 }
  0x15   :  { %38 = vadd.xlane.f32.xlu0 %v37_v11 }
  0x80   :  { %v34_v12 = vpop.xlane.xlu0 %33 }
  0x81   :  { %v40_v16 = vsel %vm29_vm0, %v34_v12, 0.0 }
  0x88   :  { %v39_v15 = vpop.xlane.xlu0 %38 }
  0x89   :  { %v41_v17 = vsel %vm29_vm0, %v39_v15, 0.0 }
  0x8a   :  { %v42_v19 = vadd.f32 %v41_v17, %v40_v16 }
  0x8c   :  { %v43_v20 = vmul.f32 0.001953125, %v42_v19 }
  0x8e   :  { %v48_v21 = vperm.slane %v43_v20, %v47_v18 }
  0x90   :  { %v50_v22 = vsub.f32 %v14_v0, %v48_v21  ;;  %v51_v23 = vsub.f32 %v15_v1, %v48_v21 }
  0x92   :  { %v52_v24 = vmul.f32 %v50_v22, %v50_v22  ;;  %v53_v25 = vmul.f32 %v51_v23, %v51_v23 }
  0x94   :  { %56 = vst [vmem:[#allocation1] ss:$2 sm:$0xff] %v52_v24 }
  0x95   :  { %60 = vst [vmem:[#allocation1 + $0x10] ss:$2 sm:$0xff] %v53_v25 }
  0x9b   :  { %v57_v26 = vld.sshfl [vmem:[#allocation1] sm:$0xff pattern:$0x75316420]  ;;  %v58_v27 = vld.sshfl [vmem:[#allocation1 + $0x8] sm:$0xff pattern:$0x75316420] }
  0x9c   :  { %v67_v28 = vsel %vm29_vm0, %v57_v26, 0.0  ;;  %v68_v29 = vsel %vm29_vm0, %v58_v27, 0.0  ;;  %v61_v31 = vld.sshfl [vmem:[#allocation1 + $0x10] sm:$0xff pattern:$0x75316420] }
  0x9d   :  { %v69_v30 = vadd.f32 %v68_v29, %v67_v28  ;;  %v62_v32 = vld.sshfl [vmem:[#allocation1 + $0x18] sm:$0xff pattern:$0x75316420]  ;;  %v72_v33 = vsel %vm29_vm0, %v61_v31, 0.0 }
  0x9e   :  { %v73_v34 = vsel %vm29_vm0, %v62_v32, 0.0 }
  0x9f   :  { %70 = vadd.xlane.f32.xlu1 %v69_v30  ;;  %v74_v35 = vadd.f32 %v73_v34, %v72_v33 }
  0xa7   :  { %75 = vadd.xlane.f32.xlu1 %v74_v35 }
 0x112   :  { %v71_v37 = vpop.xlane.xlu1 %70 }
 0x113   :  { %v77_v39 = vsel %vm29_vm0, %v71_v37, 0.0 }
 0x11a   :  { %v76_v38 = vpop.xlane.xlu1 %75 }
 0x11b   :  { %v78_v40 = vsel %vm29_vm0, %v76_v38, 0.0 }
 0x11c   :  { %v79_v41 = vadd.f32 %v78_v40, %v77_v39 }
 0x11e   :  { %v80_v42 = vmul.f32 0.001953125, %v79_v41 }
 0x120   :  { %v82_v43 = vadd.f32 1e-05, %v80_v42 }
 0x122   :  { %127 = vrsqrt.f32 %v82_v43  ;;  %vm89_vm2 = vweird.f32 %v82_v43 }
 0x128   :  { %v128_v44 = vpop.eup %127 }
 0x129   :  { %v84_v45 = vmul.f32 %v128_v44, %v82_v43  ;;  %vm90_vm1 = vweird.f32 %v128_v44 }
 0x12a   :  { %vm91_vm3 = vmor %vm89_vm2, %vm90_vm1 }
 0x12b   :  { %v85_v46 = vmul.f32 %v128_v44, %v84_v45 }
 0x12d   :  { %v86_v47 = vmul.f32 0.5, %v85_v46 }
 0x12f   :  { %v87_v48 = vsub.f32 1.5, %v86_v47 }
 0x131   :  { %v88_v50 = vmul.f32 %v128_v44, %v87_v48 }
 0x133   :  { %v92_v51 = vsel %vm91_vm3, %v128_v44, %v88_v50 }
 0x134   :  { %v93_v52 = vmul.f32 %v92_v51, %v81_v49 }
 0x136   :  { %96 = vperm.xlu2 %125, %v93_v52  }
 0x13e   :  { %108 = vperm.xlu2 %125, %v105_v53  }
 0x190   :  { %v97_v54 = vpop.permute.xlu2 %96 }
 0x191   :  { %v101_v55 = vperm.slane %v97_v54, %v47_v18 }
 0x193   :  { %v103_v57 = vmul.f32 %v101_v55, %v50_v22  ;;  %v104_v58 = vmul.f32 %v101_v55, %v51_v23 }
 0x198   :  { %v109_v56 = vpop.permute.xlu2 %108 }
 0x199   :  { %v113_v59 = vperm.slane %v109_v56, %v47_v18 }
 0x19b   :  { %v115_v60 = vadd.f32 %v113_v59, %v103_v57  ;;  %v116_v61 = vadd.f32 %v113_v59, %v104_v58 }
 0x19d   :  { %117 = vst [vmem:[%s184_s3] sm:$0xff] %v115_v60 }
 0x19e   :  { %118 = vst [vmem:[%s184_s3 + $0x8] sm:$0xff] %v116_v61 }

</bundles_post_ra>
